<compile_context>
chip_gen: v7x
topology: tpu7x:2x2x1
jax: 0.10.0
libtpu: 0.0.40
codegen_flags: <defaults>
</compile_context>

<pallas_src>
import numpy as np

import jax
import jax.numpy as jnp
from jax.experimental import pallas as pl
from jax.experimental.pallas import tpu as pltpu


# ---------------------------------------------------------------------------
# Pallas kernel: identity copy of the (1, 1) buffer through SMEM.
# Scalar-indexed access is the idiomatic SMEM pattern.
# ---------------------------------------------------------------------------
def _buffer_copy_kernel(w_ref, o_ref):
    o_ref[0, 0] = w_ref[0, 0]


def _materialize_buffer_impl(weight: jax.Array) -> jax.Array:
    """Identity copy of the buffer via a grid-less, SMEM-routed Pallas kernel."""
    return pl.pallas_call(
        _buffer_copy_kernel,
        out_shape=jax.ShapeDtypeStruct(weight.shape, weight.dtype),
        # Full-array specs (no block_shape / index_map): robust to any future
        # buffer-shape change, and SMEM is the correct home for scalar data.
        in_specs=[pl.BlockSpec(memory_space=pltpu.MemorySpace.SMEM)],
        out_specs=pl.BlockSpec(memory_space=pltpu.MemorySpace.SMEM),
    )(weight)


# Compile/trace once; subsequent calls dispatch from the cached executable.
materialize_buffer = jax.jit(_materialize_buffer_impl)


class UserDefinedLayerWithBuffer:
    """JAX mirror of the PyTorch module."""

    def __init__(self):
        # register_buffer('weight', torch.zeros(1, 1))
        self.weight = jnp.zeros((1, 1), dtype=jnp.float32)

    def forward(self):
        # PyTorch forward() is `pass` -> returns None.  No device work,
        # no host sync here.
        # TODO(synk): forward() has no outputs/compute in the reference module.
        return None

    __call__ = forward


if __name__ == "__main__":
    # forward() takes no inputs; PRNGKey kept only for a deterministic
    # (unused) example input, per the harness contract.
    key = jax.random.PRNGKey(0)
    _unused_example = jax.random.normal(key, (2, 4))  # not consumed by forward

    module = UserDefinedLayerWithBuffer()

    # Forward pass (returns None, matching `def forward(self): pass`) —
    # zero device work, zero host sync.
    result = module()
    assert result is None

    # Exercise the Pallas device path exactly once (outside the hot path).
    # Exactly one device program; final value check done on host via numpy.
    buf_out = jax.block_until_ready(materialize_buffer(module.weight))
    buf_host = np.asarray(buf_out)
    assert buf_host.shape == (1, 1)
    assert buf_host.dtype == np.float32
    assert (buf_host == 0.0).all()

    print("KERNEL_OK")
</pallas_src>

<mosaic_0001>
module attributes {stable_mosaic.version = 11 : i64} {
  func.func @_buffer_copy_kernel(%arg0: memref<1x1xf32, #tpu.memory_space<smem>>, %arg1: memref<1x1xf32, #tpu.memory_space<smem>>) attributes {dimension_semantics = [], scalar_prefetch = 0 : i64, scratch_operands = 0 : i64, tpu.core_type = #tpu.core_type<tc>} {
    %c0 = arith.constant 0 : index
    %c0_0 = arith.constant 0 : index
    %0 = memref.load %arg0[%c0, %c0_0] : memref<1x1xf32, #tpu.memory_space<smem>>
    %c0_1 = arith.constant 0 : index
    %c0_2 = arith.constant 0 : index
    %1 = memref.load %arg1[%c0_1, %c0_2] : memref<1x1xf32, #tpu.memory_space<smem>>
    memref.store %0, %arg1[%c0_1, %c0_2] : memref<1x1xf32, #tpu.memory_space<smem>>
    return
  }
}

</mosaic_0001>

<bundles_post_ra>
// kernel: _materialize_buffer_impl.1
= control target key start
LH: loop header
LB: loop body
LE: loop exit
PB: predicated region body
PF: predicated region fallthrough
CT: control target
= control target key end

     0   :  { %7 = vsyncpa [#allocation4], 0  ;;  %s65_s0 = inlined_call_operand.<no memory space> [shape: f32[1,1], index: 0, kind: input, shape index: {}]   ;;  %s66_s1 = inlined_call_operand.hbm [shape: f32[1,1], index: 1, kind: output, shape index: {}]  }
   0x1   :  { %12 = sst [smem:[#allocation3]] %s65_s0  ;;  %s27_s10 = scalar_lea.hbm %s66_s1, 16 }
   0x2   :  { %p28_p0 = scmp.ne.s32.totalorder %s66_s1, %s27_s10  ;;  %p31_p1 = scmp.lt.u32.totalorder %s27_s10, %s66_s1 }
   0x4   :  { %p33_p2 = pnand %p31_p1, %p28_p0 }
   0x6   :  { %36 = shalt.err (!%p33_p2)
}
   0x7   :  { %s39_s15 = smov [#allocation3]  }
   0x8   :  { %20 = dma.smem_to_hbm %s39_s15, 16, %s66_s1, [#allocation4]  }
   0x9   :  { %37 = dma.done.wait [#allocation4], 16  }
   0xa   :  { %38 = vsyncadd [#allocation4], 4294967280 }
   0xb   :  { %24 = sfence }
   0xc   :  { %25 = vsyncpa [#allocation4], 1 }

</bundles_post_ra>
